<compile_context>
chip_gen: v5e
topology: v5e:2x2
jax: 0.10.0
libtpu: 0.0.40
codegen_flags: <defaults>
</compile_context>

<pallas_src>
import jax
import jax.numpy as jnp
from jax.experimental import pallas as pl
from jax.experimental.pallas import tpu as pltpu

EPS = 1e-5  # PyTorch BatchNorm1d default


def _proj_kernel(g1_ref, g2_ref, w1_ref, gamma1_ref, beta1_ref,
                 w2_ref, b2_ref, gamma2_ref, beta2_ref, out_ref):
    """Single-invocation projection head for BOTH g1 and g2.

    Linear -> BN1d -> ReLU -> Linear -> BN1d, with BatchNorm in training mode
    (batch statistics, biased variance) computed independently per projection.
    Matmuls run on fused [2N, ...] rows in bf16 with f32 accumulation.
    """
    n, d = g1_ref.shape

    # Fuse both projections' rows so each Linear is one MXU pass.
    g = jnp.concatenate([g1_ref[...], g2_ref[...]], axis=0)        # [2N, D]
    g = g.astype(jnp.bfloat16)

    # ---- Linear(D -> 2D, bias=False), bf16 x bf16 -> f32 (MXU) -------------
    h = jnp.dot(g, w1_ref[...], preferred_element_type=jnp.float32)  # [2N, 2D]

    # ---- BatchNorm1d(2D), training mode, per-projection two-pass stats -----
    h = h.reshape(2, n, 2 * d)                                      # [2, N, 2D]
    mean1 = jnp.mean(h, axis=1, keepdims=True)                      # [2, 1, 2D]
    c1 = h - mean1
    var1 = jnp.mean(c1 * c1, axis=1, keepdims=True)                 # biased var
    scale1 = gamma1_ref[...] * jax.lax.rsqrt(var1 + EPS)            # folded affine
    h = c1 * scale1 + beta1_ref[...]

    # ---- ReLU ---------------------------------------------------------------
    h = jnp.maximum(h, 0.0)

    # ---- Linear(2D -> D, bias=True), bf16 x bf16 -> f32 (MXU) ---------------
    y = jnp.dot(h.reshape(2 * n, 2 * d).astype(jnp.bfloat16), w2_ref[...],
                preferred_element_type=jnp.float32)                 # [2N, D]
    y = y + b2_ref[...]

    # ---- BatchNorm1d(D), per-projection two-pass stats ----------------------
    y = y.reshape(2, n, d)
    mean2 = jnp.mean(y, axis=1, keepdims=True)
    c2 = y - mean2
    var2 = jnp.mean(c2 * c2, axis=1, keepdims=True)
    scale2 = gamma2_ref[...] * jax.lax.rsqrt(var2 + EPS)
    y = c2 * scale2 + beta2_ref[...]

    # Lane-dense store: [2, N*D] slab (N*D is a multiple of 128) instead of a
    # 32-lane-wide [2, N, D] block -> unmasked vst.
    out_ref[...] = y.reshape(2, n * d).astype(out_ref.dtype)


@jax.jit
def proj_pallas_fused(g1, g2, w1, gamma1, beta1, w2, b2, gamma2, beta2):
    """Apply the projection head to g1 and g2 in ONE pallas_call (grid=()).

    All operands live whole-in-VMEM (tiny shapes); BN statistics are computed
    per projection inside the kernel, preserving the semantics of calling the
    head separately on each projection.
    """
    n, d = g1.shape
    vmem = pl.BlockSpec(memory_space=pltpu.MemorySpace.VMEM)
    out = pl.pallas_call(
        _proj_kernel,
        out_shape=jax.ShapeDtypeStruct((2, n * d), jnp.float32),
        in_specs=[vmem] * 9,
        out_specs=vmem,
    )(g1, g2, w1, gamma1, beta1, w2, b2, gamma2, beta2)
    out = out.reshape(2, n, d)      # contiguous reshape, no data movement
    return out[0], out[1]


def proj_reference(g, w1, gamma1, beta1, w2, b2, gamma2, beta2):
    """Plain-JAX reference of the same projection head (bf16 matmul operands,
    f32 accumulation and statistics), for verification."""
    h = jnp.dot(g.astype(jnp.bfloat16), w1, preferred_element_type=jnp.float32)
    m1 = h.mean(0, keepdims=True)
    v1 = ((h - m1) ** 2).mean(0, keepdims=True)
    h = (h - m1) / jnp.sqrt(v1 + EPS) * gamma1 + beta1
    h = jnp.maximum(h, 0.0)
    y = jnp.dot(h.astype(jnp.bfloat16), w2, preferred_element_type=jnp.float32) + b2
    m2 = y.mean(0, keepdims=True)
    v2 = ((y - m2) ** 2).mean(0, keepdims=True)
    return (y - m2) / jnp.sqrt(v2 + EPS) * gamma2 + beta2


def encoder_forward(z1, z2, g1, g2, params):
    """Mirror of Encoder.forward's tail: z1/z2 pass through, g1/g2 -> proj.

    Assumes the retry loop in the original forward has made g1 and g2 the same
    shape, as it is designed to.
    """
    assert g1.shape == g2.shape, "g1/g2 row counts must match (retry loop)"
    g1o, g2o = proj_pallas_fused(g1, g2, *params)
    return z1, z2, g1o, g2o


def init_proj_params(key, emb_dim):
    """Deterministic params matching PyTorch layer shapes/init conventions.

    Weights are stored in bf16 (matmul operands); BN params and bias in f32.
    """
    d, h = emb_dim, 2 * emb_dim
    k1, k2, k3 = jax.random.split(key, 3)
    # Linear(d, 2d, bias=False): PyTorch weight [2d, d], uniform(+-1/sqrt(d)).
    w1_t = jax.random.uniform(k1, (h, d), jnp.float32, -1.0, 1.0) / jnp.sqrt(d)
    w1 = w1_t.T.astype(jnp.bfloat16)               # stored [in, out], bf16
    gamma1 = jnp.ones((1, h), jnp.float32)          # BN weight init = 1
    beta1 = jnp.zeros((1, h), jnp.float32)          # BN bias init = 0
    # Linear(2d, d, bias=True)
    w2_t = jax.random.uniform(k2, (d, h), jnp.float32, -1.0, 1.0) / jnp.sqrt(h)
    w2 = w2_t.T.astype(jnp.bfloat16)                # [in, out], bf16
    b2 = (jax.random.uniform(k3, (1, d), jnp.float32, -1.0, 1.0) / jnp.sqrt(h))
    gamma2 = jnp.ones((1, d), jnp.float32)
    beta2 = jnp.zeros((1, d), jnp.float32)
    return (w1, gamma1, beta1, w2, b2, gamma2, beta2)


if __name__ == "__main__":
    key = jax.random.PRNGKey(0)
    emb_dim = 32          # projection-head width
    num_graphs = 8        # batch of graphs -> rows of g1/g2
    num_nodes = 16        # node embeddings (z1/z2) from the abstract encoder

    kp, kz1, kz2, kg1, kg2 = jax.random.split(key, 5)
    params = init_proj_params(kp, emb_dim)

    # Abstract encoder outputs (stand-ins for self.encoder(graphN, ...)).
    z1 = jax.random.normal(kz1, (num_nodes, emb_dim), jnp.float32)
    z2 = jax.random.normal(kz2, (num_nodes, emb_dim), jnp.float32)
    g1 = jax.random.normal(kg1, (num_graphs, emb_dim), jnp.float32)
    g2 = jax.random.normal(kg2, (num_graphs, emb_dim), jnp.float32)

    z1o, z2o, g1o, g2o = encoder_forward(z1, z2, g1, g2, params)
    jax.block_until_ready((z1o, z2o, g1o, g2o))

    # Verify against a plain-JAX reference of the projection head.
    ref1 = proj_reference(g1, *params)
    ref2 = proj_reference(g2, *params)
    assert jnp.allclose(g1o, ref1, atol=1e-3, rtol=1e-3), "g1 mismatch"
    assert jnp.allclose(g2o, ref2, atol=1e-3, rtol=1e-3), "g2 mismatch"
    assert g1o.shape == (num_graphs, emb_dim) and g2o.shape == (num_graphs, emb_dim)

    print("KERNEL_OK")
</pallas_src>

<mosaic_0001>
module attributes {stable_mosaic.version = 11 : i64} {
  func.func @_proj_kernel(%arg0: memref<8x32xf32, #tpu.memory_space<vmem>>, %arg1: memref<8x32xf32, #tpu.memory_space<vmem>>, %arg2: memref<32x64xbf16, #tpu.memory_space<vmem>>, %arg3: memref<1x64xf32, #tpu.memory_space<vmem>>, %arg4: memref<1x64xf32, #tpu.memory_space<vmem>>, %arg5: memref<64x32xbf16, #tpu.memory_space<vmem>>, %arg6: memref<1x32xf32, #tpu.memory_space<vmem>>, %arg7: memref<1x32xf32, #tpu.memory_space<vmem>>, %arg8: memref<1x32xf32, #tpu.memory_space<vmem>>, %arg9: memref<2x256xf32, #tpu.memory_space<vmem>>) attributes {dimension_semantics = [], scalar_prefetch = 0 : i64, scratch_operands = 0 : i64, tpu.core_type = #tpu.core_type<tc>} {
    %c0 = arith.constant 0 : index
    %c0_0 = arith.constant 0 : index
    %0 = vector.load %arg0[%c0, %c0_0] : memref<8x32xf32, #tpu.memory_space<vmem>>, vector<8x32xf32>
    %c0_1 = arith.constant 0 : index
    %c0_2 = arith.constant 0 : index
    %1 = vector.load %arg1[%c0_1, %c0_2] : memref<8x32xf32, #tpu.memory_space<vmem>>, vector<8x32xf32>
    %2 = tpu.concatenate %0, %1 in 0 : vector<8x32xf32>, vector<8x32xf32> -> vector<16x32xf32>
    %3 = arith.truncf %2 : vector<16x32xf32> to vector<16x32xbf16>
    %c0_3 = arith.constant 0 : index
    %c0_4 = arith.constant 0 : index
    %4 = vector.load %arg2[%c0_3, %c0_4] : memref<32x64xbf16, #tpu.memory_space<vmem>>, vector<32x64xbf16>
    %cst = arith.constant dense<0.000000e+00> : vector<16x64xf32>
    %5 = tpu.matmul %3, %4, %cst {dimension_numbers = #tpu.dot_dimension_numbers<[1], [0], [0], [1], [0, 0, 1, 1], [], []>} : vector<16x32xbf16>, vector<32x64xbf16>, vector<16x64xf32> -> vector<16x64xf32>
    %6 = vector.shape_cast %5 : vector<16x64xf32> to vector<2x8x64xf32>
    %cst_5 = arith.constant dense<0.000000e+00> : vector<2x64xf32>
    %7 = vector.multi_reduction <add>, %6, %cst_5 [1] : vector<2x8x64xf32> to vector<2x64xf32>
    %8 = vector.shape_cast %7 : vector<2x64xf32> to vector<2x1x64xf32>
    %cst_6 = arith.constant 8.000000e+00 : f32
    %9 = vector.broadcast %cst_6 : f32 to vector<2x1x64xf32>
    %10 = arith.divf %8, %9 : vector<2x1x64xf32>
    %11 = vector.broadcast %10 : vector<2x1x64xf32> to vector<2x8x64xf32>
    %12 = arith.subf %6, %11 : vector<2x8x64xf32>
    %13 = arith.mulf %12, %12 : vector<2x8x64xf32>
    %cst_7 = arith.constant dense<0.000000e+00> : vector<2x64xf32>
    %14 = vector.multi_reduction <add>, %13, %cst_7 [1] : vector<2x8x64xf32> to vector<2x64xf32>
    %15 = vector.shape_cast %14 : vector<2x64xf32> to vector<2x1x64xf32>
    %cst_8 = arith.constant 8.000000e+00 : f32
    %16 = vector.broadcast %cst_8 : f32 to vector<2x1x64xf32>
    %17 = arith.divf %15, %16 : vector<2x1x64xf32>
    %c0_9 = arith.constant 0 : index
    %c0_10 = arith.constant 0 : index
    %18 = vector.load %arg3[%c0_9, %c0_10] : memref<1x64xf32, #tpu.memory_space<vmem>>, vector<1x64xf32>
    %cst_11 = arith.constant 9.99999974E-6 : f32
    %19 = vector.broadcast %cst_11 : f32 to vector<2x1x64xf32>
    %20 = arith.addf %17, %19 : vector<2x1x64xf32>
    %21 = math.rsqrt %20 : vector<2x1x64xf32>
    %22 = vector.shape_cast %18 : vector<1x64xf32> to vector<1x1x64xf32>
    %23 = vector.broadcast %22 : vector<1x1x64xf32> to vector<2x1x64xf32>
    %24 = arith.mulf %23, %21 : vector<2x1x64xf32>
    %25 = vector.broadcast %24 : vector<2x1x64xf32> to vector<2x8x64xf32>
    %26 = arith.mulf %12, %25 : vector<2x8x64xf32>
    %c0_12 = arith.constant 0 : index
    %c0_13 = arith.constant 0 : index
    %27 = vector.load %arg4[%c0_12, %c0_13] : memref<1x64xf32, #tpu.memory_space<vmem>>, vector<1x64xf32>
    %28 = vector.shape_cast %27 : vector<1x64xf32> to vector<1x1x64xf32>
    %29 = vector.broadcast %28 : vector<1x1x64xf32> to vector<2x8x64xf32>
    %30 = arith.addf %26, %29 : vector<2x8x64xf32>
    %cst_14 = arith.constant 0.000000e+00 : f32
    %31 = vector.broadcast %cst_14 : f32 to vector<2x8x64xf32>
    %32 = arith.maximumf %30, %31 : vector<2x8x64xf32>
    %33 = vector.shape_cast %32 : vector<2x8x64xf32> to vector<16x64xf32>
    %34 = arith.truncf %33 : vector<16x64xf32> to vector<16x64xbf16>
    %c0_15 = arith.constant 0 : index
    %c0_16 = arith.constant 0 : index
    %35 = vector.load %arg5[%c0_15, %c0_16] : memref<64x32xbf16, #tpu.memory_space<vmem>>, vector<64x32xbf16>
    %cst_17 = arith.constant dense<0.000000e+00> : vector<16x32xf32>
    %36 = tpu.matmul %34, %35, %cst_17 {dimension_numbers = #tpu.dot_dimension_numbers<[1], [0], [0], [1], [0, 0, 1, 1], [], []>} : vector<16x64xbf16>, vector<64x32xbf16>, vector<16x32xf32> -> vector<16x32xf32>
    %c0_18 = arith.constant 0 : index
    %c0_19 = arith.constant 0 : index
    %37 = vector.load %arg6[%c0_18, %c0_19] : memref<1x32xf32, #tpu.memory_space<vmem>>, vector<1x32xf32>
    %38 = vector.broadcast %37 : vector<1x32xf32> to vector<16x32xf32>
    %39 = arith.addf %36, %38 : vector<16x32xf32>
    %40 = vector.shape_cast %39 : vector<16x32xf32> to vector<2x8x32xf32>
    %cst_20 = arith.constant dense<0.000000e+00> : vector<2x32xf32>
    %41 = vector.multi_reduction <add>, %40, %cst_20 [1] : vector<2x8x32xf32> to vector<2x32xf32>
    %42 = vector.shape_cast %41 : vector<2x32xf32> to vector<2x1x32xf32>
    %cst_21 = arith.constant 8.000000e+00 : f32
    %43 = vector.broadcast %cst_21 : f32 to vector<2x1x32xf32>
    %44 = arith.divf %42, %43 : vector<2x1x32xf32>
    %45 = vector.broadcast %44 : vector<2x1x32xf32> to vector<2x8x32xf32>
    %46 = arith.subf %40, %45 : vector<2x8x32xf32>
    %47 = arith.mulf %46, %46 : vector<2x8x32xf32>
    %cst_22 = arith.constant dense<0.000000e+00> : vector<2x32xf32>
    %48 = vector.multi_reduction <add>, %47, %cst_22 [1] : vector<2x8x32xf32> to vector<2x32xf32>
    %49 = vector.shape_cast %48 : vector<2x32xf32> to vector<2x1x32xf32>
    %cst_23 = arith.constant 8.000000e+00 : f32
    %50 = vector.broadcast %cst_23 : f32 to vector<2x1x32xf32>
    %51 = arith.divf %49, %50 : vector<2x1x32xf32>
    %c0_24 = arith.constant 0 : index
    %c0_25 = arith.constant 0 : index
    %52 = vector.load %arg7[%c0_24, %c0_25] : memref<1x32xf32, #tpu.memory_space<vmem>>, vector<1x32xf32>
    %cst_26 = arith.constant 9.99999974E-6 : f32
    %53 = vector.broadcast %cst_26 : f32 to vector<2x1x32xf32>
    %54 = arith.addf %51, %53 : vector<2x1x32xf32>
    %55 = math.rsqrt %54 : vector<2x1x32xf32>
    %56 = vector.shape_cast %52 : vector<1x32xf32> to vector<1x1x32xf32>
    %57 = vector.broadcast %56 : vector<1x1x32xf32> to vector<2x1x32xf32>
    %58 = arith.mulf %57, %55 : vector<2x1x32xf32>
    %59 = vector.broadcast %58 : vector<2x1x32xf32> to vector<2x8x32xf32>
    %60 = arith.mulf %46, %59 : vector<2x8x32xf32>
    %c0_27 = arith.constant 0 : index
    %c0_28 = arith.constant 0 : index
    %61 = vector.load %arg8[%c0_27, %c0_28] : memref<1x32xf32, #tpu.memory_space<vmem>>, vector<1x32xf32>
    %62 = vector.shape_cast %61 : vector<1x32xf32> to vector<1x1x32xf32>
    %63 = vector.broadcast %62 : vector<1x1x32xf32> to vector<2x8x32xf32>
    %64 = arith.addf %60, %63 : vector<2x8x32xf32>
    %65 = vector.shape_cast %64 : vector<2x8x32xf32> to vector<2x256xf32>
    %c0_29 = arith.constant 0 : index
    %c0_30 = arith.constant 0 : index
    %66 = vector.load %arg9[%c0_29, %c0_30] : memref<2x256xf32, #tpu.memory_space<vmem>>, vector<2x256xf32>
    tpu.vector_store %arg9[%c0_29, %c0_30], %65 {strides = array<i32>} : memref<2x256xf32, #tpu.memory_space<vmem>>, vector<2x256xf32>,
    return
  }
}

</mosaic_0001>

<bundles_post_ra>
// kernel: squeeze.2
= control target key start
LH: loop header
LB: loop body
LE: loop exit
PB: predicated region body
PF: predicated region fallthrough
CT: control target
= control target key end

     0   :  { %s90_s0 = inlined_call_operand.vmem [shape: f32[256], index: 0, kind: input, shape index: {}]   ;;  %s91_s1 = inlined_call_operand.hbm [shape: f32[8,32], index: 1, kind: output, shape index: {}]  }
   0x1   :  { %v5_v0 = vld [vmem:[%s90_s0] sm:$0x3] }
   0x2   :  { %6 = vst [vmem:[#allocation2] sm:$0x3] %v5_v0 }
   0x3   :  { %2 = vsyncpa [#allocation1], 0  ;;  %s70_s0 = smov 96   ;;  %s71_s8 = smov 32   ;;  %vm8_vm0 = vcmask 261120  }
   0x4   :  { %s72_s9 = smov 64   ;;  %s73_s10 = smov [#allocation0]  }
   0x5   :  { %s31_s11 = sshll.u32 %s73_s10, 4  ;;  %s33_s1 = sshll.u32 %s91_s1, 4  ;;  %s32_s11 = int_to_ptr.vmem [resolvable:$true] %s31_s11  ;;  %s34_s1 = int_to_ptr.hbm [resolvable:$true] %s33_s1 }
   0x9   :  { %v10_v1 = vld [vmem:[#allocation2] sm:$0x3]  }
   0xa   :  { %v22_v2 = vld [vmem:[#allocation2] sm:$0x3]   ;;  %11 = vrot.lane.b32.xlu0 %v10_v1, %s70_s0 }
   0xb   :  { %23 = vrot.lane.b32.xlu1 %v22_v2, %s71_s8  ;;  %v16_v3 = vld [vmem:[#allocation2] sm:$0x3]  }
   0xc   :  { %v7_v4 = vld [vmem:[#allocation2] sm:$0x3]  }
   0xd   :  { %9 = vst.msk [vmem:[#allocation0] ss:$4 sm:$0x3] %vm8_vm0, %v7_v4  }
  0x12   :  { %17 = vrot.lane.b32.xlu0 %v16_v3, %s72_s9 }
  0x7c   :  { %v12_v5 = vpop.permute.xlu0 %11  }
  0x7d   :  { %v24_v6 = vpop.permute.xlu1 %23   ;;  %15 = vst.msk [vmem:[#allocation0 + $0x1] ss:$4 sm:$0x3] %vm8_vm0, %v12_v5  }
  0x7e   :  { %27 = vst.msk [vmem:[#allocation0 + $0x3] ss:$4 sm:$0x3] %vm8_vm0, %v24_v6  }
  0x84   :  { %v18_v7 = vpop.permute.xlu0 %17  }
  0x85   :  { %21 = vst.msk [vmem:[#allocation0 + $0x2] ss:$4 sm:$0x3] %vm8_vm0, %v18_v7  }
  0x86   :  { %36 = dma.vmem_to_hbm [thread:$0]  %s32_s11, 128, %s34_s1, [#allocation1]  }
  0x87   :  { %68 = dma.done.wait [#allocation1], 128  }
  0x88   :  { %69 = vsyncadd [#allocation1], 4294967168 }
  0x89   :  { %39 = vsyncpa [#allocation1], 1 }

// kernel: proj_pallas_fused.1
= control target key start
LH: loop header
LB: loop body
LE: loop exit
PB: predicated region body
PF: predicated region fallthrough
CT: control target
= control target key end

     0   :  { %vm52_vm0 = vcmask 261120   ;;  %v430_v5 = vmov 8.0   ;;  %vm70_vm1 = vcmask 523264   ;;  %vm285_vm15 = vcmask 1047556   ;;  %s435_s28 = smov 96   ;;  %s562_s2 = inlined_call_operand.vmem [shape: bf16[32,64], index: 2, kind: input, shape index: {}]   ;;  %s563_s0 = inlined_call_operand.vmem [shape: f32[8,32], index: 0, kind: input, shape index: {}]   ;;  %s564_s1 = inlined_call_operand.vmem [shape: f32[8,32], index: 1, kind: input, shape index: {}]   ;;  %s565_s4 = inlined_call_operand.vmem [shape: f32[1,64], index: 4, kind: input, shape index: {}]   ;;  %s566_s6 = inlined_call_operand.vmem [shape: f32[1,32], index: 6, kind: input, shape index: {}]   ;;  %s567_s8 = inlined_call_operand.vmem [shape: f32[1,32], index: 8, kind: input, shape index: {}]   ;;  %s568_s5 = inlined_call_operand.vmem [shape: bf16[64,32], index: 5, kind: input, shape index: {}]   ;;  %s569_s3 = inlined_call_operand.vmem [shape: f32[1,64], index: 3, kind: input, shape index: {}]   ;;  %s570_s7 = inlined_call_operand.vmem [shape: f32[1,32], index: 7, kind: input, shape index: {}]   ;;  %s571_s9 = inlined_call_operand.vmem [shape: f32[2,256], index: 9, kind: output, shape index: {}]  }
   0x1   :  { %v406_v0 = vld [vmem:[%s562_s2 + $0x8] sm:$0xff]  ;;  %v405_v1 = vld [vmem:[%s562_s2] sm:$0xff]  ;;  %420 = vrcp.f32 %v430_v5  ;;  %v410_v38 = vld [vmem:[%s568_s5 + $0x18] sm:$0xff] }
   0x2   :  { %62 = vmatpush.bf16.msra.mxu0 %v406_v0  ;;  %v33_v2 = vld [vmem:[%s563_s0] sm:$0xff]  ;;  %199 = vmatpush.bf16.msra.mxu1 %v410_v38  ;;  %v409_v43 = vld [vmem:[%s568_s5 + $0x10] sm:$0xff]  ;;  %v408_v48 = vld [vmem:[%s568_s5 + $0x8] sm:$0xff] }
   0x3   :  { %v34_v3 = vld [vmem:[%s564_s1] sm:$0xff] }
   0x4   :  { %v35_v4 = vpack.c.bf16 %v34_v3, %v33_v2  ;;  %v407_v52 = vld [vmem:[%s568_s5] sm:$0xff] }
   0x5   :  { %v114_v62 = vld [vmem:[%s569_s3] sm:$0x1] }
   0x6   :  { %63 = vmatpush.bf16.msra.mxu0 %v405_v1  ;;  %200 = vmatpush.bf16.msra.mxu1 %v409_v43 }
   0x7   :  { %v421_v6 = vpop.eup %420 }
   0x8   :  { %v86_v7 = vmul.f32 8.0, %v421_v6  ;;  %vm90_vm2 = vweird.f32 %v421_v6 }
   0x9   :  { %387 = vmatmul.msk.bf16.vlgmr.msra.gmra.mxu0 %vm52_vm0, %v35_v4 }
   0xa   :  { %v87_v8 = vsub.f32 1.0, %v86_v7  ;;  %201 = vmatpush.bf16.msra.mxu1 %v408_v48 }
   0xc   :  { %v88_v12 = vmul.f32 %v421_v6, %v87_v8 }
   0xe   :  { %v89_v15 = vadd.f32 %v421_v6, %v88_v12  ;;  %202 = vmatpush.bf16.msra.mxu1 %v407_v52 }
  0x10   :  { %v501_v21 = vsel %vm90_vm2, %v421_v6, %v89_v15  ;;  %vm363_vm2 = vcmask 785408  }
  0x86   :  { %v65_v9 = vpop.f32.mrf.mxu0 }
  0x87   :  { %v71_v10 = vsel %vm70_vm1, %v65_v9, 0.0 }
  0x88   :  { %v72_v11 = vrot.slane %v71_v10, 4 }
  0x8a   :  { %v73_v13 = vadd.f32 %v72_v11, %v71_v10  ;;  %v417_v10 = vld [vmem:[%s565_s4] ss:$0 sm:$0xff] }
  0x8c   :  { %v74_v14 = vrot.slane %v73_v13, 2 }
  0x8e   :  { %v75_v16 = vadd.f32 %v74_v14, %v73_v13  ;;  %v67_v17 = vpop.f32.mrf.mxu0 }
  0x8f   :  { %v78_v18 = vsel %vm70_vm1, %v67_v17, 0.0 }
  0x90   :  { %v76_v19 = vrot.slane %v75_v16, 1  ;;  %v79_v20 = vrot.slane %v78_v18, 4 }
  0x92   :  { %v77_v22 = vadd.f32 %v76_v19, %v75_v16  ;;  %v80_v23 = vadd.f32 %v79_v20, %v78_v18  ;;  %v418_v19 = vld [vmem:[%s566_s6] ss:$0 sm:$0xff] }
  0x94   :  { %v92_v24 = vmul.f32 %v501_v21, %v77_v22  ;;  %v81_v25 = vrot.slane %v80_v23, 2 }
  0x96   :  { %v94_v26 = vsub.f32 %v65_v9, %v92_v24  ;;  %v82_v27 = vadd.f32 %v81_v25, %v80_v23 }
  0x98   :  { %v96_v28 = vmul.f32 %v94_v26, %v94_v26  ;;  %v83_v29 = vrot.slane %v82_v27, 1 }
  0x9a   :  { %v98_v30 = vsel %vm70_vm1, %v96_v28, 0.0  ;;  %v84_v31 = vadd.f32 %v83_v29, %v82_v27 }
  0x9b   :  { %v99_v32 = vrot.slane %v98_v30, 4 }
  0x9c   :  { %v93_v33 = vmul.f32 %v501_v21, %v84_v31 }
  0x9d   :  { %v100_v34 = vadd.f32 %v99_v32, %v98_v30 }
  0x9e   :  { %v95_v35 = vsub.f32 %v67_v17, %v93_v33 }
  0x9f   :  { %v101_v36 = vrot.slane %v100_v34, 2 }
  0xa0   :  { %v97_v37 = vmul.f32 %v95_v35, %v95_v35 }
  0xa1   :  { %v102_v39 = vadd.f32 %v101_v36, %v100_v34 }
  0xa2   :  { %v105_v40 = vsel %vm70_vm1, %v97_v37, 0.0 }
  0xa3   :  { %v103_v41 = vrot.slane %v102_v39, 1  ;;  %v106_v42 = vrot.slane %v105_v40, 4 }
  0xa5   :  { %v104_v44 = vadd.f32 %v103_v41, %v102_v39  ;;  %v107_v45 = vadd.f32 %v106_v42, %v105_v40 }
  0xa7   :  { %v112_v46 = vmul.f32 %v104_v44, %v501_v21  ;;  %v108_v47 = vrot.slane %v107_v45, 2 }
  0xa9   :  { %v115_v49 = vadd.f32 1e-05, %v112_v46  ;;  %v109_v50 = vadd.f32 %v108_v47, %v107_v45 }
  0xab   :  { %422 = vrsqrt.f32 %v115_v49  ;;  %v110_v51 = vrot.slane %v109_v50, 1  ;;  %vm123_vm4 = vweird.f32 %v115_v49 }
  0xad   :  { %v111_v53 = vadd.f32 %v110_v51, %v109_v50 }
  0xaf   :  { %v113_v54 = vmul.f32 %v111_v53, %v501_v21 }
  0xb1   :  { %v423_v55 = vpop.eup %422  ;;  %v116_v56 = vadd.f32 1e-05, %v113_v54 }
  0xb2   :  { %v118_v57 = vmul.f32 %v423_v55, %v115_v49  ;;  %vm124_vm3 = vweird.f32 %v423_v55 }
  0xb3   :  { %424 = vrsqrt.f32 %v116_v56  ;;  %vm125_vm5 = vmor %vm123_vm4, %vm124_vm3  ;;  %vm133_vm7 = vweird.f32 %v116_v56  ;;  %vm371_vm3 = vcmask 1041408  }
  0xb4   :  { %v119_v58 = vmul.f32 %v423_v55, %v118_v57 }
  0xb6   :  { %v120_v59 = vmul.f32 0.5, %v119_v58 }
  0xb8   :  { %v121_v60 = vsub.f32 1.5, %v120_v59 }
  0xb9   :  { %v425_v61 = vpop.eup %424 }
  0xba   :  { %v122_v63 = vmul.f32 %v423_v55, %v121_v60  ;;  %v128_v0 = vmul.f32 %v425_v61, %v116_v56  ;;  %vm134_vm6 = vweird.f32 %v425_v61 }
  0xbb   :  { %vm135_vm8 = vmor %vm133_vm7, %vm134_vm6 }
  0xbc   :  { %v126_v1 = vsel %vm125_vm5, %v423_v55, %v122_v63  ;;  %v129_v2 = vmul.f32 %v425_v61, %v128_v0 }
  0xbd   :  { %v137_v3 = vmul.f32 %v126_v1, %v114_v62 }
  0xbe   :  { %v130_v4 = vmul.f32 0.5, %v129_v2 }
  0xbf   :  { %v141_v6 = vperm.slane %v137_v3, 0 }
  0xc0   :  { %v131_v5 = vsub.f32 1.5, %v130_v4 }
  0xc1   :  { %v145_v9 = vmul.f32 %v141_v6, %v94_v26 }
  0xc2   :  { %v132_v7 = vmul.f32 %v425_v61, %v131_v5  ;;  %v245_v5 = vld [vmem:[%s570_s7] sm:$0x1]  ;;  %s433_s7 = smov 64  }
  0xc3   :  { %v151_v13 = vadd.f32 %v417_v10, %v145_v9 }
  0xc4   :  { %v136_v8 = vsel %vm135_vm8, %v425_v61, %v132_v7 }
  0xc5   :  { %v138_v11 = vmul.f32 %v136_v8, %v114_v62  ;;  %v153_v17 = vmax.f32 %v151_v13, 0.0 }
  0xc7   :  { %v142_v12 = vperm.slane %v138_v11, 0 }
  0xc9   :  { %v146_v14 = vmul.f32 %v142_v12, %v95_v35  ;;  %v419_v12 = vld [vmem:[%s567_s8] ss:$0 sm:$0xff]  ;;  %s434_s8 = smov 32  }
  0xcb   :  { %v152_v15 = vadd.f32 %v417_v10, %v146_v14 }
  0xcd   :  { %v154_v16 = vmax.f32 %v152_v15, 0.0  ;;  %v431_v15 = vmov 1983009808  }
  0xcf   :  { %v155_v18 = vpack.c.bf16 %v154_v16, %v153_v17  ;;  %v288_v16 = vunpack.c.l.s4 %v431_v15 }
  0xd1   :  { %404 = vmatmul.msk.bf16.vlgmr.msra.gmra.mxu1 %vm70_vm1, %v155_v18 }
 0x14e   :  { %v204_v20 = vpop.f32.mrf.mxu1 }
 0x14f   :  { %v205_v22 = vadd.f32 %v418_v19, %v204_v20  ;;  %v289_v20 = vunpack.c.0.s8 %v288_v16 }
 0x151   :  { %v209_v23 = vsel %vm52_vm0, %v205_v22, 0.0 }
 0x152   :  { %v210_v24 = vrot.slane %v209_v23, 4 }
 0x154   :  { %v211_v25 = vadd.f32 %v210_v24, %v209_v23 }
 0x156   :  { %v212_v26 = vrot.slane %v211_v25, 2  ;;  %v206_v27 = vpop.f32.mrf.mxu1 }
 0x157   :  { %v207_v28 = vadd.f32 %v418_v19, %v206_v27 }
 0x158   :  { %v213_v29 = vadd.f32 %v212_v26, %v211_v25  ;;  %v432_v25 = vmov 1934713408  }
 0x159   :  { %v216_v30 = vsel %vm52_vm0, %v207_v28, 0.0  ;;  %v310_v26 = vunpack.c.l.s4 %v432_v25 }
 0x15a   :  { %v214_v31 = vrot.slane %v213_v29, 1  ;;  %v217_v32 = vrot.slane %v216_v30, 4 }
 0x15c   :  { %v215_v33 = vadd.f32 %v214_v31, %v213_v29  ;;  %v218_v34 = vadd.f32 %v217_v32, %v216_v30  ;;  %v311_v31 = vunpack.c.0.s8 %v310_v26 }
 0x15e   :  { %v223_v35 = vmul.f32 %v215_v33, %v501_v21  ;;  %v219_v36 = vrot.slane %v218_v34, 2 }
 0x160   :  { %v225_v37 = vsub.f32 %v205_v22, %v223_v35  ;;  %v220_v38 = vadd.f32 %v219_v36, %v218_v34 }
 0x162   :  { %v227_v39 = vmul.f32 %v225_v37, %v225_v37  ;;  %v221_v40 = vrot.slane %v220_v38, 1 }
 0x164   :  { %v229_v41 = vsel %vm52_vm0, %v227_v39, 0.0  ;;  %v222_v42 = vadd.f32 %v221_v40, %v220_v38 }
 0x165   :  { %v230_v43 = vrot.slane %v229_v41, 4 }
 0x166   :  { %v224_v44 = vmul.f32 %v222_v42, %v501_v21 }
 0x167   :  { %v231_v45 = vadd.f32 %v230_v43, %v229_v41 }
 0x168   :  { %v226_v46 = vsub.f32 %v207_v28, %v224_v44 }
 0x169   :  { %v232_v47 = vrot.slane %v231_v45, 2 }
 0x16a   :  { %v228_v48 = vmul.f32 %v226_v46, %v226_v46 }
 0x16b   :  { %v233_v49 = vadd.f32 %v232_v47, %v231_v45 }
 0x16c   :  { %v236_v50 = vsel %vm52_vm0, %v228_v48, 0.0 }
 0x16d   :  { %v234_v51 = vrot.slane %v233_v49, 1  ;;  %v237_v52 = vrot.slane %v236_v50, 4 }
 0x16f   :  { %v235_v53 = vadd.f32 %v234_v51, %v233_v49  ;;  %v238_v54 = vadd.f32 %v237_v52, %v236_v50 }
 0x171   :  { %v243_v55 = vmul.f32 %v235_v53, %v501_v21  ;;  %v239_v56 = vrot.slane %v238_v54, 2 }
 0x173   :  { %v246_v57 = vadd.f32 1e-05, %v243_v55  ;;  %v240_v58 = vadd.f32 %v239_v56, %v238_v54 }
 0x175   :  { %426 = vrsqrt.f32 %v246_v57  ;;  %v241_v59 = vrot.slane %v240_v58, 1  ;;  %vm254_vm10 = vweird.f32 %v246_v57 }
 0x177   :  { %v242_v60 = vadd.f32 %v241_v59, %v240_v58 }
 0x179   :  { %v244_v61 = vmul.f32 %v242_v60, %v501_v21 }
 0x17b   :  { %v427_v62 = vpop.eup %426  ;;  %v247_v63 = vadd.f32 1e-05, %v244_v61 }
 0x17c   :  { %v249_v0 = vmul.f32 %v427_v62, %v246_v57  ;;  %vm255_vm9 = vweird.f32 %v427_v62 }
 0x17d   :  { %428 = vrsqrt.f32 %v247_v63  ;;  %vm256_vm11 = vmor %vm254_vm10, %vm255_vm9  ;;  %vm264_vm13 = vweird.f32 %v247_v63 }
 0x17e   :  { %v250_v1 = vmul.f32 %v427_v62, %v249_v0 }
 0x180   :  { %v251_v2 = vmul.f32 0.5, %v250_v1 }
 0x182   :  { %v252_v3 = vsub.f32 1.5, %v251_v2 }
 0x183   :  { %v429_v4 = vpop.eup %428 }
 0x184   :  { %v253_v6 = vmul.f32 %v427_v62, %v252_v3  ;;  %v259_v7 = vmul.f32 %v429_v4, %v247_v63  ;;  %vm265_vm12 = vweird.f32 %v429_v4 }
 0x185   :  { %vm266_vm14 = vmor %vm264_vm13, %vm265_vm12 }
 0x186   :  { %v257_v8 = vsel %vm256_vm11, %v427_v62, %v253_v6  ;;  %v260_v9 = vmul.f32 %v429_v4, %v259_v7 }
 0x187   :  { %v268_v21 = vmul.f32 %v257_v8, %v245_v5 }
 0x188   :  { %v261_v10 = vmul.f32 0.5, %v260_v9 }
 0x189   :  { %v272_v11 = vperm.slane %v268_v21, 0 }
 0x18a   :  { %v262_v13 = vsub.f32 1.5, %v261_v10 }
 0x18b   :  { %v276_v14 = vmul.f32 %v272_v11, %v225_v37 }
 0x18c   :  { %v263_v17 = vmul.f32 %v429_v4, %v262_v13 }
 0x18d   :  { %v282_v18 = vadd.f32 %v419_v12, %v276_v14 }
 0x18e   :  { %v267_v19 = vsel %vm266_vm14, %v429_v4, %v263_v17 }
 0x18f   :  { %v269_v22 = vmul.f32 %v267_v19, %v245_v5  ;;  %v284_v23 = vrot.slane %v282_v18, 4  ;;  %v290_v27 = vperm.slane %v282_v18, %v289_v20 }
 0x191   :  { %v273_v24 = vperm.slane %v269_v22, 0  ;;  %v286_v29 = vsel %vm285_vm15, 0.0, %v284_v23  ;;  %v307_v34 = vrot.slane %v290_v27, 4 }
 0x192   :  { %v294_v35 = vperm.slane %v286_v29, %v289_v20 }
 0x193   :  { %v277_v28 = vmul.f32 %v273_v24, %v226_v46 }
 0x194   :  { %v319_v42 = vrot.slane %v294_v35, 4 }
 0x195   :  { %v283_v30 = vadd.f32 %v419_v12, %v277_v28 }
 0x197   :  { %v295_v32 = vrot.slane %v283_v30, 4  ;;  %v300_v33 = vperm.slane %v283_v30, %v289_v20 }
 0x199   :  { %v296_v36 = vsel %vm285_vm15, 0.0, %v295_v32  ;;  %v305_v37 = vrot.slane %v300_v33, 4  ;;  %v308_v38 = vsel %vm285_vm15, %v300_v33, %v307_v34 }
 0x19a   :  { %v304_v39 = vperm.slane %v296_v36, %v289_v20  ;;  %v316_v40 = vperm.slane %v308_v38, %v311_v31 }
 0x19b   :  { %v306_v41 = vsel %vm285_vm15, %v305_v37, %v290_v27 }
 0x19c   :  { %342 = vrot.lane.b32.xlu2 %v316_v40, %s433_s7  ;;  %v312_v43 = vperm.slane %v306_v41, %v311_v31  ;;  %v317_v44 = vrot.slane %v304_v39, 4  ;;  %v320_v45 = vsel %vm285_vm15, %v304_v39, %v319_v42  ;;  %v331_v48 = vrot.slane %v316_v40, 4 }
 0x19d   :  { %v328_v51 = vperm.slane %v320_v45, %v311_v31 }
 0x19e   :  { %v329_v46 = vrot.slane %v312_v43, 4  ;;  %v318_v47 = vsel %vm285_vm15, %v317_v44, %v294_v35  ;;  %v332_v53 = vsel %vm285_vm15, 0.0, %v331_v48 }
 0x19f   :  { %v324_v49 = vperm.slane %v318_v47, %v311_v31  ;;  %v335_v55 = vrot.slane %v328_v51, 4 }
 0x1a0   :  { %v330_v50 = vsel %vm285_vm15, 0.0, %v329_v46 }
 0x1a1   :  { %338 = vrot.lane.b32.xlu1 %v330_v50, %s434_s8  ;;  %v333_v52 = vrot.slane %v324_v49, 4  ;;  %v336_v56 = vsel %vm285_vm15, 0.0, %v335_v55 }
 0x1a3   :  { %v334_v54 = vsel %vm285_vm15, 0.0, %v333_v52 }
 0x1a4   :  { %346 = vrot.lane.b32.xlu2 %v332_v53, %s435_s28  ;;  %350 = vrot.lane.b32.xlu0 %v334_v54, %s434_s8 }
 0x1a9   :  { %358 = vrot.lane.b32.xlu1 %v336_v56, %s435_s28 }
 0x1ac   :  { %354 = vrot.lane.b32.xlu0 %v328_v51, %s433_s7 }
 0x1f6   :  { %v343_v59 = vpop.permute.xlu2 %342 }
 0x1fe   :  { %v347_v3 = vpop.permute.xlu2 %346 }
 0x213   :  { %v339_v57 = vpop.permute.xlu1 %338 }
 0x214   :  { %v361_v60 = vsel %vm52_vm0, %v312_v43, %v339_v57 }
 0x215   :  { %v362_v63 = vsel %vm70_vm1, %v361_v60, %v343_v59 }
 0x216   :  { %v351_v58 = vpop.permute.xlu0 %350  ;;  %v364_v5 = vsel %vm363_vm2, %v362_v63, %v347_v3 }
 0x217   :  { %v365_v61 = vsel %vm52_vm0, %v324_v49, %v351_v58 }
 0x21b   :  { %v359_v0 = vpop.permute.xlu1 %358 }
 0x21e   :  { %v355_v62 = vpop.permute.xlu0 %354 }
 0x21f   :  { %v366_v1 = vsel %vm70_vm1, %v365_v61, %v355_v62 }
 0x220   :  { %v367_v2 = vsel %vm363_vm2, %v366_v1, %v359_v0 }
 0x221   :  { %v370_v4 = vrot.slane %v367_v2, 6 }
 0x223   :  { %v372_v6 = vsel %vm371_vm3, %v364_v5, %v370_v4 }
 0x224   :  { %374 = vst [vmem:[%s571_s9] sm:$0xf] %v372_v6 }

</bundles_post_ra>
